<compile_context>
chip_gen: v7x
topology: tpu7x:2x2x1
jax: 0.10.0
libtpu: 0.0.40
codegen_flags: <defaults>
</compile_context>

<pallas_src>
import functools

import jax
import jax.numpy as jnp
from jax.experimental import pallas as pl
from jax.experimental.pallas import tpu as pltpu


# ----------------------------------------------------------------------------
# Fused kernel: mlp0 -> mlp1 -> mlp2 -> mlp3 -> MSE-sum, all in one invocation.
# ----------------------------------------------------------------------------
def fused_mlp_mse_kernel(x_ref, tgt_ref, w1_ref, b1_ref, w2_ref, b2_ref,
                         o_ref, loss_ref):
    """Runs all layers with the activation resident in VMEM/vregs.

    x_ref:   (B, D)      f32
    tgt_ref: (B, D)      f32
    w1_ref:  (L, D, D)   bf16   (pre-transposed: y = x @ W)
    b1_ref:  (L, 1, D)   f32
    w2_ref:  (L, D, D)   bf16
    b2_ref:  (L, 1, D)   f32
    o_ref:   (B, D)      f32    final logits
    loss_ref:(1, 1)      f32    scalar MSE-sum in SMEM
    """
    n_layers = w1_ref.shape[0]
    x = x_ref[...].astype(jnp.float32)

    # Statically unrolled layer loop; no intermediate HBM traffic.
    for l in range(n_layers):
        h = jnp.dot(x.astype(jnp.bfloat16), w1_ref[l],
                    preferred_element_type=jnp.float32) + b1_ref[l]
        h = jnp.maximum(h, 0.0)                       # ReLU (VPU)
        x = jnp.dot(h.astype(jnp.bfloat16), w2_ref[l],
                    preferred_element_type=jnp.float32) + b2_ref[l]

    o_ref[...] = x.astype(o_ref.dtype)

    # MSE(reduction='sum') epilogue while the activation is still in vregs.
    d = x - tgt_ref[...].astype(jnp.float32)
    loss_ref[0, 0] = jnp.sum(d * d)


# ----------------------------------------------------------------------------
# Wrapper
# ----------------------------------------------------------------------------
def fused_forward(x, target, w1s, b1s, w2s, b2s):
    B, D = x.shape
    vmem = pl.BlockSpec(memory_space=pltpu.VMEM)

    # Rough resident-VMEM footprint; only raise the scoped limit when needed
    # (relevant for the real d_hid=1024 case on v5e/v6e).
    footprint = (w1s.nbytes + w2s.nbytes + b1s.nbytes + b2s.nbytes
                 + 4 * x.nbytes + target.nbytes)
    compiler_params = None
    if footprint > (16 << 20):
        compiler_params = pltpu.CompilerParams(
            vmem_limit_bytes=min(int(footprint * 3 // 2), 48 << 20))

    logits, loss = pl.pallas_call(
        fused_mlp_mse_kernel,
        out_shape=(jax.ShapeDtypeStruct((B, D), jnp.float32),
                   jax.ShapeDtypeStruct((1, 1), jnp.float32)),
        in_specs=[vmem, vmem, vmem, vmem, vmem, vmem],
        out_specs=(vmem, pl.BlockSpec(memory_space=pltpu.SMEM)),
        compiler_params=compiler_params,
    )(x, target, w1s, b1s, w2s, b2s)
    return logits, loss[0, 0]


@jax.jit
def example_code_forward(params, x, target):
    w1s, b1s, w2s, b2s = params
    logits, loss = fused_forward(x, target, w1s, b1s, w2s, b2s)
    return {"logits": logits, "loss": loss}


# ----------------------------------------------------------------------------
# Parameter init (mimics torch.nn.Linear default U(-1/sqrt(fan_in), 1/sqrt(fan_in)))
# Weights stored [d_in, d_out] (transposed vs. torch's [out, in]) in bf16,
# biases kept in f32.
# ----------------------------------------------------------------------------
def init_params(key, d_hid, n_mlps=4):
    w1s, b1s, w2s, b2s = [], [], [], []
    bound = 1.0 / float(jnp.sqrt(d_hid))
    for _ in range(n_mlps):
        key, k1w, k1b, k2w, k2b = jax.random.split(key, 5)
        w1s.append(jax.random.uniform(k1w, (d_hid, d_hid), jnp.float32,
                                      -bound, bound).astype(jnp.bfloat16))
        b1s.append(jax.random.uniform(k1b, (1, d_hid), jnp.float32, -bound, bound))
        w2s.append(jax.random.uniform(k2w, (d_hid, d_hid), jnp.float32,
                                      -bound, bound).astype(jnp.bfloat16))
        b2s.append(jax.random.uniform(k2b, (1, d_hid), jnp.float32, -bound, bound))
    return (jnp.stack(w1s), jnp.stack(b1s), jnp.stack(w2s), jnp.stack(b2s))


if __name__ == "__main__":
    d_hid = 128      # small version of the original d_hid = 1024
    batch = 8
    n_mlps = 4

    key = jax.random.PRNGKey(0)
    key, kx, kt, kp = jax.random.split(key, 4)

    x = jax.random.normal(kx, (batch, d_hid), jnp.float32)
    target = jax.random.normal(kt, (batch, d_hid), jnp.float32)
    params = init_params(kp, d_hid, n_mlps)

    out = example_code_forward(params, x, target)
    jax.block_until_ready(out)

    # Plain-JAX reference with identical precision policy
    # (bf16 operands on the MXU, f32 accumulation), for a fair check.
    w1s, b1s, w2s, b2s = params
    ref = x
    for l in range(n_mlps):
        h = jnp.dot(ref.astype(jnp.bfloat16), w1s[l],
                    preferred_element_type=jnp.float32) + b1s[l]
        h = jnp.maximum(h, 0.0)
        ref = jnp.dot(h.astype(jnp.bfloat16), w2s[l],
                      preferred_element_type=jnp.float32) + b2s[l]
    ref_loss = jnp.sum((ref - target) ** 2)

    assert jnp.allclose(out["logits"], ref, atol=1e-2, rtol=1e-2), "logits mismatch"
    assert jnp.allclose(out["loss"], ref_loss, atol=1e-1, rtol=1e-2), "loss mismatch"

    print("KERNEL_OK")
</pallas_src>

<mosaic_0001>
module attributes {stable_mosaic.version = 11 : i64} {
  func.func @fused_mlp_mse_kernel(%arg0: memref<8x128xf32, #tpu.memory_space<vmem>>, %arg1: memref<8x128xf32, #tpu.memory_space<vmem>>, %arg2: memref<4x128x128xbf16, #tpu.memory_space<vmem>>, %arg3: memref<4x1x128xf32, #tpu.memory_space<vmem>>, %arg4: memref<4x128x128xbf16, #tpu.memory_space<vmem>>, %arg5: memref<4x1x128xf32, #tpu.memory_space<vmem>>, %arg6: memref<8x128xf32, #tpu.memory_space<vmem>>, %arg7: memref<1x1xf32, #tpu.memory_space<smem>>) attributes {dimension_semantics = [], scalar_prefetch = 0 : i64, scratch_operands = 0 : i64, tpu.core_type = #tpu.core_type<tc>} {
    %c0 = arith.constant 0 : index
    %c0_0 = arith.constant 0 : index
    %0 = vector.load %arg0[%c0, %c0_0] : memref<8x128xf32, #tpu.memory_space<vmem>>, vector<8x128xf32>
    %1 = arith.truncf %0 : vector<8x128xf32> to vector<8x128xbf16>
    %c0_1 = arith.constant 0 : index
    %c0_2 = arith.constant 0 : index
    %c0_3 = arith.constant 0 : index
    %2 = vector.load %arg2[%c0_1, %c0_2, %c0_3] : memref<4x128x128xbf16, #tpu.memory_space<vmem>>, vector<1x128x128xbf16>
    %3 = vector.shape_cast %2 : vector<1x128x128xbf16> to vector<128x128xbf16>
    %cst = arith.constant dense<0.000000e+00> : vector<8x128xf32>
    %4 = tpu.matmul %1, %3, %cst {dimension_numbers = #tpu.dot_dimension_numbers<[1], [0], [0], [1], [0, 0, 1, 1], [], []>} : vector<8x128xbf16>, vector<128x128xbf16>, vector<8x128xf32> -> vector<8x128xf32>
    %c0_4 = arith.constant 0 : index
    %c0_5 = arith.constant 0 : index
    %c0_6 = arith.constant 0 : index
    %5 = vector.load %arg3[%c0_4, %c0_5, %c0_6] : memref<4x1x128xf32, #tpu.memory_space<vmem>>, vector<1x1x128xf32>
    %6 = vector.shape_cast %5 : vector<1x1x128xf32> to vector<1x128xf32>
    %7 = vector.broadcast %6 : vector<1x128xf32> to vector<8x128xf32>
    %8 = arith.addf %4, %7 : vector<8x128xf32>
    %cst_7 = arith.constant 0.000000e+00 : f32
    %9 = vector.broadcast %cst_7 : f32 to vector<8x128xf32>
    %10 = arith.maximumf %8, %9 : vector<8x128xf32>
    %11 = arith.truncf %10 : vector<8x128xf32> to vector<8x128xbf16>
    %c0_8 = arith.constant 0 : index
    %c0_9 = arith.constant 0 : index
    %c0_10 = arith.constant 0 : index
    %12 = vector.load %arg4[%c0_8, %c0_9, %c0_10] : memref<4x128x128xbf16, #tpu.memory_space<vmem>>, vector<1x128x128xbf16>
    %13 = vector.shape_cast %12 : vector<1x128x128xbf16> to vector<128x128xbf16>
    %cst_11 = arith.constant dense<0.000000e+00> : vector<8x128xf32>
    %14 = tpu.matmul %11, %13, %cst_11 {dimension_numbers = #tpu.dot_dimension_numbers<[1], [0], [0], [1], [0, 0, 1, 1], [], []>} : vector<8x128xbf16>, vector<128x128xbf16>, vector<8x128xf32> -> vector<8x128xf32>
    %c0_12 = arith.constant 0 : index
    %c0_13 = arith.constant 0 : index
    %c0_14 = arith.constant 0 : index
    %15 = vector.load %arg5[%c0_12, %c0_13, %c0_14] : memref<4x1x128xf32, #tpu.memory_space<vmem>>, vector<1x1x128xf32>
    %16 = vector.shape_cast %15 : vector<1x1x128xf32> to vector<1x128xf32>
    %17 = vector.broadcast %16 : vector<1x128xf32> to vector<8x128xf32>
    %18 = arith.addf %14, %17 : vector<8x128xf32>
    %19 = arith.truncf %18 : vector<8x128xf32> to vector<8x128xbf16>
    %c1 = arith.constant 1 : index
    %c0_15 = arith.constant 0 : index
    %c0_16 = arith.constant 0 : index
    %20 = vector.load %arg2[%c1, %c0_15, %c0_16] : memref<4x128x128xbf16, #tpu.memory_space<vmem>>, vector<1x128x128xbf16>
    %21 = vector.shape_cast %20 : vector<1x128x128xbf16> to vector<128x128xbf16>
    %cst_17 = arith.constant dense<0.000000e+00> : vector<8x128xf32>
    %22 = tpu.matmul %19, %21, %cst_17 {dimension_numbers = #tpu.dot_dimension_numbers<[1], [0], [0], [1], [0, 0, 1, 1], [], []>} : vector<8x128xbf16>, vector<128x128xbf16>, vector<8x128xf32> -> vector<8x128xf32>
    %c1_18 = arith.constant 1 : index
    %c0_19 = arith.constant 0 : index
    %c0_20 = arith.constant 0 : index
    %23 = vector.load %arg3[%c1_18, %c0_19, %c0_20] : memref<4x1x128xf32, #tpu.memory_space<vmem>>, vector<1x1x128xf32>
    %24 = vector.shape_cast %23 : vector<1x1x128xf32> to vector<1x128xf32>
    %25 = vector.broadcast %24 : vector<1x128xf32> to vector<8x128xf32>
    %26 = arith.addf %22, %25 : vector<8x128xf32>
    %cst_21 = arith.constant 0.000000e+00 : f32
    %27 = vector.broadcast %cst_21 : f32 to vector<8x128xf32>
    %28 = arith.maximumf %26, %27 : vector<8x128xf32>
    %29 = arith.truncf %28 : vector<8x128xf32> to vector<8x128xbf16>
    %c1_22 = arith.constant 1 : index
    %c0_23 = arith.constant 0 : index
    %c0_24 = arith.constant 0 : index
    %30 = vector.load %arg4[%c1_22, %c0_23, %c0_24] : memref<4x128x128xbf16, #tpu.memory_space<vmem>>, vector<1x128x128xbf16>
    %31 = vector.shape_cast %30 : vector<1x128x128xbf16> to vector<128x128xbf16>
    %cst_25 = arith.constant dense<0.000000e+00> : vector<8x128xf32>
    %32 = tpu.matmul %29, %31, %cst_25 {dimension_numbers = #tpu.dot_dimension_numbers<[1], [0], [0], [1], [0, 0, 1, 1], [], []>} : vector<8x128xbf16>, vector<128x128xbf16>, vector<8x128xf32> -> vector<8x128xf32>
    %c1_26 = arith.constant 1 : index
    %c0_27 = arith.constant 0 : index
    %c0_28 = arith.constant 0 : index
    %33 = vector.load %arg5[%c1_26, %c0_27, %c0_28] : memref<4x1x128xf32, #tpu.memory_space<vmem>>, vector<1x1x128xf32>
    %34 = vector.shape_cast %33 : vector<1x1x128xf32> to vector<1x128xf32>
    %35 = vector.broadcast %34 : vector<1x128xf32> to vector<8x128xf32>
    %36 = arith.addf %32, %35 : vector<8x128xf32>
    %37 = arith.truncf %36 : vector<8x128xf32> to vector<8x128xbf16>
    %c2 = arith.constant 2 : index
    %c0_29 = arith.constant 0 : index
    %c0_30 = arith.constant 0 : index
    %38 = vector.load %arg2[%c2, %c0_29, %c0_30] : memref<4x128x128xbf16, #tpu.memory_space<vmem>>, vector<1x128x128xbf16>
    %39 = vector.shape_cast %38 : vector<1x128x128xbf16> to vector<128x128xbf16>
    %cst_31 = arith.constant dense<0.000000e+00> : vector<8x128xf32>
    %40 = tpu.matmul %37, %39, %cst_31 {dimension_numbers = #tpu.dot_dimension_numbers<[1], [0], [0], [1], [0, 0, 1, 1], [], []>} : vector<8x128xbf16>, vector<128x128xbf16>, vector<8x128xf32> -> vector<8x128xf32>
    %c2_32 = arith.constant 2 : index
    %c0_33 = arith.constant 0 : index
    %c0_34 = arith.constant 0 : index
    %41 = vector.load %arg3[%c2_32, %c0_33, %c0_34] : memref<4x1x128xf32, #tpu.memory_space<vmem>>, vector<1x1x128xf32>
    %42 = vector.shape_cast %41 : vector<1x1x128xf32> to vector<1x128xf32>
    %43 = vector.broadcast %42 : vector<1x128xf32> to vector<8x128xf32>
    %44 = arith.addf %40, %43 : vector<8x128xf32>
    %cst_35 = arith.constant 0.000000e+00 : f32
    %45 = vector.broadcast %cst_35 : f32 to vector<8x128xf32>
    %46 = arith.maximumf %44, %45 : vector<8x128xf32>
    %47 = arith.truncf %46 : vector<8x128xf32> to vector<8x128xbf16>
    %c2_36 = arith.constant 2 : index
    %c0_37 = arith.constant 0 : index
    %c0_38 = arith.constant 0 : index
    %48 = vector.load %arg4[%c2_36, %c0_37, %c0_38] : memref<4x128x128xbf16, #tpu.memory_space<vmem>>, vector<1x128x128xbf16>
    %49 = vector.shape_cast %48 : vector<1x128x128xbf16> to vector<128x128xbf16>
    %cst_39 = arith.constant dense<0.000000e+00> : vector<8x128xf32>
    %50 = tpu.matmul %47, %49, %cst_39 {dimension_numbers = #tpu.dot_dimension_numbers<[1], [0], [0], [1], [0, 0, 1, 1], [], []>} : vector<8x128xbf16>, vector<128x128xbf16>, vector<8x128xf32> -> vector<8x128xf32>
    %c2_40 = arith.constant 2 : index
    %c0_41 = arith.constant 0 : index
    %c0_42 = arith.constant 0 : index
    %51 = vector.load %arg5[%c2_40, %c0_41, %c0_42] : memref<4x1x128xf32, #tpu.memory_space<vmem>>, vector<1x1x128xf32>
    %52 = vector.shape_cast %51 : vector<1x1x128xf32> to vector<1x128xf32>
    %53 = vector.broadcast %52 : vector<1x128xf32> to vector<8x128xf32>
    %54 = arith.addf %50, %53 : vector<8x128xf32>
    %55 = arith.truncf %54 : vector<8x128xf32> to vector<8x128xbf16>
    %c3 = arith.constant 3 : index
    %c0_43 = arith.constant 0 : index
    %c0_44 = arith.constant 0 : index
    %56 = vector.load %arg2[%c3, %c0_43, %c0_44] : memref<4x128x128xbf16, #tpu.memory_space<vmem>>, vector<1x128x128xbf16>
    %57 = vector.shape_cast %56 : vector<1x128x128xbf16> to vector<128x128xbf16>
    %cst_45 = arith.constant dense<0.000000e+00> : vector<8x128xf32>
    %58 = tpu.matmul %55, %57, %cst_45 {dimension_numbers = #tpu.dot_dimension_numbers<[1], [0], [0], [1], [0, 0, 1, 1], [], []>} : vector<8x128xbf16>, vector<128x128xbf16>, vector<8x128xf32> -> vector<8x128xf32>
    %c3_46 = arith.constant 3 : index
    %c0_47 = arith.constant 0 : index
    %c0_48 = arith.constant 0 : index
    %59 = vector.load %arg3[%c3_46, %c0_47, %c0_48] : memref<4x1x128xf32, #tpu.memory_space<vmem>>, vector<1x1x128xf32>
    %60 = vector.shape_cast %59 : vector<1x1x128xf32> to vector<1x128xf32>
    %61 = vector.broadcast %60 : vector<1x128xf32> to vector<8x128xf32>
    %62 = arith.addf %58, %61 : vector<8x128xf32>
    %cst_49 = arith.constant 0.000000e+00 : f32
    %63 = vector.broadcast %cst_49 : f32 to vector<8x128xf32>
    %64 = arith.maximumf %62, %63 : vector<8x128xf32>
    %65 = arith.truncf %64 : vector<8x128xf32> to vector<8x128xbf16>
    %c3_50 = arith.constant 3 : index
    %c0_51 = arith.constant 0 : index
    %c0_52 = arith.constant 0 : index
    %66 = vector.load %arg4[%c3_50, %c0_51, %c0_52] : memref<4x128x128xbf16, #tpu.memory_space<vmem>>, vector<1x128x128xbf16>
    %67 = vector.shape_cast %66 : vector<1x128x128xbf16> to vector<128x128xbf16>
    %cst_53 = arith.constant dense<0.000000e+00> : vector<8x128xf32>
    %68 = tpu.matmul %65, %67, %cst_53 {dimension_numbers = #tpu.dot_dimension_numbers<[1], [0], [0], [1], [0, 0, 1, 1], [], []>} : vector<8x128xbf16>, vector<128x128xbf16>, vector<8x128xf32> -> vector<8x128xf32>
    %c3_54 = arith.constant 3 : index
    %c0_55 = arith.constant 0 : index
    %c0_56 = arith.constant 0 : index
    %69 = vector.load %arg5[%c3_54, %c0_55, %c0_56] : memref<4x1x128xf32, #tpu.memory_space<vmem>>, vector<1x1x128xf32>
    %70 = vector.shape_cast %69 : vector<1x1x128xf32> to vector<1x128xf32>
    %71 = vector.broadcast %70 : vector<1x128xf32> to vector<8x128xf32>
    %72 = arith.addf %68, %71 : vector<8x128xf32>
    %c0_57 = arith.constant 0 : index
    %c0_58 = arith.constant 0 : index
    %73 = vector.load %arg6[%c0_57, %c0_58] : memref<8x128xf32, #tpu.memory_space<vmem>>, vector<8x128xf32>
    tpu.vector_store %arg6[%c0_57, %c0_58], %72 {strides = array<i32>} : memref<8x128xf32, #tpu.memory_space<vmem>>, vector<8x128xf32>,
    %c0_59 = arith.constant 0 : index
    %c0_60 = arith.constant 0 : index
    %74 = vector.load %arg1[%c0_59, %c0_60] : memref<8x128xf32, #tpu.memory_space<vmem>>, vector<8x128xf32>
    %75 = arith.subf %72, %74 : vector<8x128xf32>
    %76 = arith.mulf %75, %75 : vector<8x128xf32>
    %77 = vector.shape_cast %76 : vector<8x128xf32> to vector<1x8x128xf32>
    %cst_61 = arith.constant dense<0.000000e+00> : vector<1xf32>
    %78 = vector.multi_reduction <add>, %77, %cst_61 [1, 2] : vector<1x8x128xf32> to vector<1xf32>
    %79 = vector.shape_cast %78 : vector<1xf32> to vector<1x1x1xf32>
    %80 = vector.extract %79[0, 0, 0] : f32 from vector<1x1x1xf32>
    %c0_62 = arith.constant 0 : index
    %c0_63 = arith.constant 0 : index
    %81 = memref.load %arg7[%c0_62, %c0_63] : memref<1x1xf32, #tpu.memory_space<smem>>
    memref.store %80, %arg7[%c0_62, %c0_63] : memref<1x1xf32, #tpu.memory_space<smem>>
    return
  }
}

</mosaic_0001>

<bundles_post_ra>
// kernel: example_code_forward.1
= control target key start
LH: loop header
LB: loop body
LE: loop exit
PB: predicated region body
PF: predicated region fallthrough
CT: control target
= control target key end

     0   :  { %13 = vsyncpa [#allocation3], 0  ;;  %s1776_s0 = inlined_call_operand.vmem [shape: f32[8,128], index: 0, kind: input, shape index: {}]   ;;  %s1777_s1 = inlined_call_operand.vmem [shape: f32[8,128], index: 1, kind: input, shape index: {}]   ;;  %s1778_s2 = inlined_call_operand.hbm [shape: bf16[4,128,128], index: 2, kind: input, shape index: {}]   ;;  %s1779_s3 = inlined_call_operand.hbm [shape: f32[4,1,128], index: 3, kind: input, shape index: {}]   ;;  %s1780_s4 = inlined_call_operand.hbm [shape: bf16[4,128,128], index: 4, kind: input, shape index: {}]   ;;  %s1781_s5 = inlined_call_operand.hbm [shape: f32[4,1,128], index: 5, kind: input, shape index: {}]   ;;  %s1782_s6 = inlined_call_operand.hbm [shape: f32[8,128], index: 6, kind: output, shape index: {0}]   ;;  %s1783_s7 = inlined_call_operand.hbm [shape: f32[1,1], index: 7, kind: output, shape index: {1}]  }
   0x1   :  { %14 = vsyncpa [#allocation7], 0 }
   0x2   :  { %15 = vsyncpa [#allocation10], 0 }
   0x3   :  { %16 = vsyncpa [#allocation4], 0 }
   0x4   :  { %17 = vsyncpa [#allocation5], 0  ;;  %s1553_s24 = smov [#allocation6]   ;;  %s1423_s28 = scalar_lea.hbm %s1779_s3, 64 }
   0x5   :  { %s39_s25 = sshll.u32 %s1553_s24, 4  ;;  %p1424_p0 = scmp.ne.s32.totalorder %s1779_s3, %s1423_s28  ;;  %s40_s25 = int_to_ptr.vmem [resolvable:$true] %s39_s25 }
   0x6   :  { %p1427_p1 = scmp.lt.u32.totalorder %s1423_s28, %s1779_s3 }
   0x8   :  { %p1429_p2 = pnand %p1427_p1, %p1424_p0 }
   0xa   :  { %1432 = shalt.err (!%p1429_p2)
}
   0xb   :  { %s1433_s10 = scalar_lea.vmem %s40_s25, 64  ;;  %p1438_p4 = scmp.lt.s32.totalorder %s40_s25, %s40_s25 }
   0xc   :  { %p1434_p3 = scmp.ne.s32.totalorder %s40_s25, %s1433_s10  ;;  %p1439_p5 = scmp.lt.s32.totalorder %s1433_s10, %s1433_s10 }
   0xe   :  { %p1440_p6 = por %p1439_p5, %p1438_p4 }
  0x10   :  { %p1441_p7 = pnand %p1440_p6, %p1434_p3 }
  0x12   :  { %1444 = shalt.err (!%p1441_p7)
}
  0x13   :  { %s1554_s11 = smov 16   ;;  %s1555_s12 = smov 1  }
  0x14   :  { %45 = dma.hbm_to_vmem [thread:$0]  %s1779_s3, 64, %s40_s25, [#allocation7], %s1554_s11, %s1554_s11, %s1555_s12  }
  0x15   :  { %s1556_s15 = smov [#allocation2]   ;;  %s1445_s19 = scalar_lea.hbm %s1778_s2, 4096 }
  0x16   :  { %s27_s16 = sshll.u32 %s1556_s15, 4  ;;  %p1446_p8 = scmp.ne.s32.totalorder %s1778_s2, %s1445_s19  ;;  %s28_s16 = int_to_ptr.vmem [resolvable:$true] %s27_s16 }
  0x17   :  { %p1449_p9 = scmp.lt.u32.totalorder %s1445_s19, %s1778_s2 }
  0x19   :  { %p1451_p10 = pnand %p1449_p9, %p1446_p8 }
  0x1b   :  { %1454 = shalt.err (!%p1451_p10)
}
  0x1c   :  { %s1455_s24 = scalar_lea.vmem %s28_s16, 4096  ;;  %p1460_p12 = scmp.lt.s32.totalorder %s28_s16, %s28_s16 }
  0x1d   :  { %p1456_p11 = scmp.ne.s32.totalorder %s28_s16, %s1455_s24  ;;  %p1461_p13 = scmp.lt.s32.totalorder %s1455_s24, %s1455_s24 }
  0x1f   :  { %p1462_p0 = por %p1461_p13, %p1460_p12 }
  0x21   :  { %p1463_p1 = pnand %p1462_p0, %p1456_p11 }
  0x23   :  { %1466 = shalt.err (!%p1463_p1)
}
  0x24   :  { %s1557_s3 = smov 64   ;;  %s1558_s25 = smov 4  }
  0x25   :  { %33 = dma.hbm_to_vmem [thread:$0]  %s1778_s2, 4096, %s28_s16, [#allocation3], %s1557_s3, %s1557_s3, %s1558_s25  }
  0x26   :  { %s1559_s28 = smov [#allocation8]   ;;  %s1560_s30 = smov [#allocation9]  }
  0x27   :  { %s51_s29 = sshll.u32 %s1559_s28, 4  ;;  %s63_s8 = sshll.u32 %s1560_s30, 4  ;;  %s52_s29 = int_to_ptr.vmem [resolvable:$true] %s51_s29  ;;  %s1632_s8 = int_to_ptr.vmem [resolvable:$true] %s63_s8 }
  0x28   :  { %s1467_s13 = scalar_lea.hbm %s1780_s4, 4096 }
  0x29   :  { %p1468_p2 = scmp.ne.s32.totalorder %s1780_s4, %s1467_s13  ;;  %p1471_p3 = scmp.lt.u32.totalorder %s1467_s13, %s1780_s4 }
  0x2b   :  { %p1473_p4 = pnand %p1471_p3, %p1468_p2 }
  0x2d   :  { %1476 = shalt.err (!%p1473_p4)
}
  0x2e   :  { %s1477_s2 = scalar_lea.vmem %s52_s29, 4096  ;;  %p1482_p6 = scmp.lt.s32.totalorder %s52_s29, %s52_s29 }
  0x2f   :  { %p1478_p5 = scmp.ne.s32.totalorder %s52_s29, %s1477_s2  ;;  %p1483_p7 = scmp.lt.s32.totalorder %s1477_s2, %s1477_s2 }
  0x31   :  { %p1484_p8 = por %p1483_p7, %p1482_p6 }
  0x33   :  { %p1485_p9 = pnand %p1484_p8, %p1478_p5 }
  0x35   :  { %1488 = shalt.err (!%p1485_p9)
}
  0x36   :  { %57 = dma.hbm_to_vmem [thread:$0]  %s1780_s4, 4096, %s52_s29, [#allocation7], %s1557_s3, %s1557_s3, %s1558_s25  }
  0x37   :  { %s1489_s22 = scalar_lea.hbm %s1781_s5, 64 }
  0x38   :  { %p1490_p10 = scmp.ne.s32.totalorder %s1781_s5, %s1489_s22  ;;  %p1493_p11 = scmp.lt.u32.totalorder %s1489_s22, %s1781_s5 }
  0x3a   :  { %p1495_p12 = pnand %p1493_p11, %p1490_p10 }
  0x3c   :  { %1498 = shalt.err (!%p1495_p12)
}
  0x3d   :  { %s1499_s28 = scalar_lea.vmem %s1632_s8, 64  ;;  %p1504_p0 = scmp.lt.s32.totalorder %s1632_s8, %s1632_s8 }
  0x3e   :  { %p1500_p13 = scmp.ne.s32.totalorder %s1632_s8, %s1499_s28  ;;  %p1505_p1 = scmp.lt.s32.totalorder %s1499_s28, %s1499_s28 }
  0x40   :  { %p1506_p2 = por %p1505_p1, %p1504_p0 }
  0x42   :  { %p1507_p3 = pnand %p1506_p2, %p1500_p13 }
  0x44   :  { %1510 = shalt.err (!%p1507_p3)
}
  0x45   :  { %69 = dma.hbm_to_vmem [thread:$0]  %s1781_s5, 64, %s1632_s8, [#allocation10], %s1554_s11, %s1554_s11, %s1555_s12  }
  0x46   :  { %1543 = dma.done.wait [#allocation3], 4096  }
  0x47   :  { %1544 = vsyncadd [#allocation3], 4294963200 }
  0x48   :  { %1545 = dma.done.wait [#allocation7], 4160  }
  0x49   :  { %1546 = vsyncadd [#allocation7], 4294963136 }
  0x4a   :  { %1547 = dma.done.wait [#allocation10], 64  }
  0x4b   :  { %1548 = vsyncadd [#allocation10], 4294967232  ;;  %v1561_v0 = vmov 0.0   ;;  %vm1562_vm0 = vmmov 0   ;;  %v1359_v1 = vld [vmem:[#allocation2] sm:$0xff]   ;;  %v1360_v2 = vld [vmem:[#allocation2 + $0x8] sm:$0xff]  }
  0x4c   :  { %1185 = vmatprep.subr.bf16.mxu0 %v1561_v0  ;;  %1201 = vmatprep.mubr.msk.bf16.mxu0 %vm1562_vm0, %v1561_v0  ;;  %v1361_v3 = vld [vmem:[#allocation2 + $0x10] sm:$0xff]   ;;  %v1367_v4 = vld [vmem:[#allocation8] sm:$0xff]   ;;  %v1362_v5 = vld [vmem:[#allocation2 + $0x18] sm:$0xff]   ;;  %s1563_s25 = smov [#allocation11]  }
  0x4d   :  { %1205 = vmatprep.subr.bf16.mxu1 %v1561_v0  ;;  %1221 = vmatprep.mubr.msk.bf16.mxu1 %vm1562_vm0, %v1561_v0  ;;  %v1368_v6 = vld [vmem:[#allocation8 + $0x8] sm:$0xff]   ;;  %v1363_v7 = vld [vmem:[#allocation2 + $0x20] sm:$0xff]   ;;  %v1369_v8 = vld [vmem:[#allocation8 + $0x10] sm:$0xff]   ;;  %s1017_s29 = sshll.u32 %s1563_s25, 4  ;;  %s1018_s29 = int_to_ptr.vmem [resolvable:$true] %s1017_s29 }
  0x4e   :  { %1186 = vmatpush3.bf16.msra.mxu0 %v1359_v1  ;;  %1206 = vmatpush3.bf16.msra.mxu1 %v1367_v4  ;;  %v1364_v9 = vld [vmem:[#allocation2 + $0x28] sm:$0xff]   ;;  %v1370_v10 = vld [vmem:[#allocation8 + $0x18] sm:$0xff]   ;;  %v1365_v11 = vld [vmem:[#allocation2 + $0x30] sm:$0xff]   ;;  %s1511_s30 = scalar_lea.vmem %s1018_s29, 128  ;;  %p1516_p5 = scmp.lt.s32.totalorder %s1018_s29, %s1018_s29 }
  0x4f   :  { %1187 = vmatprep.subr.bf16.mxu0 %v1561_v0  ;;  %1207 = vmatprep.subr.bf16.mxu1 %v1561_v0  ;;  %v1371_v12 = vld [vmem:[#allocation8 + $0x20] sm:$0xff]   ;;  %v1366_v13 = vld [vmem:[#allocation2 + $0x38] sm:$0xff]   ;;  %v1372_v15 = vld [vmem:[#allocation8 + $0x28] sm:$0xff]   ;;  %p1512_p4 = scmp.ne.s32.totalorder %s1018_s29, %s1511_s30  ;;  %p1517_p6 = scmp.lt.s32.totalorder %s1511_s30, %s1511_s30 }
  0x50   :  { %v83_v14 = vld [vmem:[%s1776_s0] sm:$0xff]  ;;  %v1373_v17 = vld [vmem:[#allocation8 + $0x30] sm:$0xff]   ;;  %v1376_v20 = vld [vmem:[#allocation2 + $0x48] sm:$0xff]  }
  0x51   :  { %v84_v16 = vpack.c.bf16 %v83_v14, %v83_v14  ;;  %v1374_v18 = vld [vmem:[#allocation8 + $0x38] sm:$0xff]   ;;  %v1377_v21 = vld [vmem:[#allocation2 + $0x50] sm:$0xff]   ;;  %v1380_v24 = vld [vmem:[#allocation2 + $0x68] sm:$0xff]   ;;  %p1518_p7 = por %p1517_p6, %p1516_p5 }
  0x52   :  { %1188 = vmatpush3.bf16.msra.mxu0 %v1360_v2  ;;  %1208 = vmatpush3.bf16.msra.mxu1 %v1368_v6  ;;  %v1375_v19 = vld [vmem:[#allocation2 + $0x40] sm:$0xff]   ;;  %v1378_v22 = vld [vmem:[#allocation2 + $0x58] sm:$0xff]   ;;  %v1381_v25 = vld [vmem:[#allocation2 + $0x70] sm:$0xff]  }
  0x53   :  { %1189 = vmatprep.subr.bf16.mxu0 %v1561_v0  ;;  %1209 = vmatprep.subr.bf16.mxu1 %v1561_v0  ;;  %v1379_v23 = vld [vmem:[#allocation2 + $0x60] sm:$0xff]   ;;  %v1382_v34 = vld [vmem:[#allocation2 + $0x78] sm:$0xff]   ;;  %v1384_v36 = vld [vmem:[#allocation8 + $0x48] sm:$0xff]   ;;  %p1519_p8 = pnand %p1518_p7, %p1512_p4 }
  0x54   :  { %v1041_v26 = vld [vmem:[#allocation6] ss:$0 sm:$0xff]  ;;  %v1383_v35 = vld [vmem:[#allocation8 + $0x40] sm:$0xff]   ;;  %v1385_v37 = vld [vmem:[#allocation8 + $0x50] sm:$0xff]  }
  0x55   :  { %v1386_v38 = vld [vmem:[#allocation8 + $0x58] sm:$0xff]   ;;  %v1387_v39 = vld [vmem:[#allocation8 + $0x60] sm:$0xff]   ;;  %v1388_v40 = vld [vmem:[#allocation8 + $0x68] sm:$0xff]  }
  0x56   :  { %1190 = vmatpush3.bf16.msra.mxu0 %v1361_v3  ;;  %1210 = vmatpush3.bf16.msra.mxu1 %v1369_v8  ;;  %v1050_v41 = vld [vmem:[#allocation9] ss:$0 sm:$0xff]  ;;  %v1389_v48 = vld [vmem:[#allocation8 + $0x70] sm:$0xff]   ;;  %v1390_v49 = vld [vmem:[#allocation8 + $0x78] sm:$0xff]  }
  0x57   :  { %1191 = vmatprep.subr.bf16.mxu0 %v1561_v0  ;;  %1211 = vmatprep.subr.bf16.mxu1 %v1561_v0  ;;  %v1391_v50 = vld [vmem:[#allocation2 + $0x80] sm:$0xff]   ;;  %v1392_v51 = vld [vmem:[#allocation2 + $0x88] sm:$0xff]   ;;  %v1393_v52 = vld [vmem:[#allocation2 + $0x90] sm:$0xff]  }
  0x58   :  { %v1394_v53 = vld [vmem:[#allocation2 + $0x98] sm:$0xff]   ;;  %v1395_v54 = vld [vmem:[#allocation2 + $0xa0] sm:$0xff]   ;;  %v1396_v55 = vld [vmem:[#allocation2 + $0xa8] sm:$0xff]  }
  0x59   :  { %v1397_v56 = vld [vmem:[#allocation2 + $0xb0] sm:$0xff]   ;;  %v1059_v57 = vld [vmem:[#allocation6 + $0x1] ss:$0 sm:$0xff]  ;;  %v1398_v2 = vld [vmem:[#allocation2 + $0xb8] sm:$0xff]  }
  0x5a   :  { %1192 = vmatpush3.bf16.msra.mxu0 %v1362_v5  ;;  %1212 = vmatpush3.bf16.msra.mxu1 %v1370_v10  ;;  %v1399_v3 = vld [vmem:[#allocation8 + $0x80] sm:$0xff]   ;;  %v1400_v4 = vld [vmem:[#allocation8 + $0x88] sm:$0xff]   ;;  %v1401_v5 = vld [vmem:[#allocation8 + $0x90] sm:$0xff]  }
  0x5b   :  { %1193 = vmatprep.subr.bf16.mxu0 %v1561_v0  ;;  %1213 = vmatprep.subr.bf16.mxu1 %v1561_v0  ;;  %v1402_v6 = vld [vmem:[#allocation8 + $0x98] sm:$0xff]   ;;  %v1404_v8 = vld [vmem:[#allocation8 + $0xa8] sm:$0xff]  }
  0x5e   :  { %1194 = vmatpush3.bf16.msra.mxu0 %v1363_v7  ;;  %1214 = vmatpush3.bf16.msra.mxu1 %v1371_v12  ;;  %v1403_v7 = vld [vmem:[#allocation8 + $0xa0] sm:$0xff]  }
  0x5f   :  { %1195 = vmatprep.subr.bf16.mxu0 %v1561_v0  ;;  %1215 = vmatprep.subr.bf16.mxu1 %v1561_v0 }
  0x62   :  { %1196 = vmatpush3.bf16.msra.mxu0 %v1364_v9  ;;  %1216 = vmatpush3.bf16.msra.mxu1 %v1372_v15  ;;  %v1068_v9 = vld [vmem:[#allocation9 + $0x1] ss:$0 sm:$0xff] }
  0x63   :  { %1197 = vmatprep.subr.bf16.mxu0 %v1561_v0  ;;  %1217 = vmatprep.subr.bf16.mxu1 %v1561_v0 }
  0x66   :  { %1198 = vmatpush3.bf16.msra.mxu0 %v1365_v11  ;;  %1218 = vmatpush3.bf16.msra.mxu1 %v1373_v17  ;;  %v1406_v17 = vld [vmem:[#allocation8 + $0xb8] sm:$0xff]  }
  0x67   :  { %1199 = vmatprep.subr.bf16.mxu0 %v1561_v0  ;;  %1219 = vmatprep.subr.bf16.mxu1 %v1561_v0 }
  0x6a   :  { %1200 = vmatpush3.bf16.msra.mxu0 %v1366_v13  ;;  %1220 = vmatpush3.bf16.msra.mxu1 %v1374_v18  ;;  %v1407_v18 = vld [vmem:[#allocation2 + $0xc0] sm:$0xff]  }
  0x6b   :  { %1225 = vmatprep.subr.bf16.mxu0 %v1561_v0  ;;  %1245 = vmatprep.subr.bf16.mxu1 %v1561_v0 }
  0x6d   :  { %1202 = vmatmul.mubr.bf16.vlgmr.msra.gmra.mrb[0].mxu0 %v84_v16  ;;  %v1405_v16 = vld [vmem:[#allocation8 + $0xb0] sm:$0xff]  }
  0x6e   :  { %1241 = vmatprep.mubr.msk.bf16.mxu0 %vm1562_vm0, %v1561_v0  ;;  %1226 = vmatpush3.bf16.msra.mxu0 %v1375_v19  ;;  %v1408_v19 = vld [vmem:[#allocation2 + $0xc8] sm:$0xff]  }
  0x6f   :  { %1227 = vmatprep.subr.bf16.mxu0 %v1561_v0 }
  0x72   :  { %1228 = vmatpush3.bf16.msra.mxu0 %v1376_v20  ;;  %v1409_v20 = vld [vmem:[#allocation2 + $0xd0] sm:$0xff]  }
  0x73   :  { %1229 = vmatprep.subr.bf16.mxu0 %v1561_v0 }
  0x76   :  { %1230 = vmatpush3.bf16.msra.mxu0 %v1377_v21  ;;  %v1410_v21 = vld [vmem:[#allocation2 + $0xd8] sm:$0xff]  }
  0x77   :  { %1231 = vmatprep.subr.bf16.mxu0 %v1561_v0 }
  0x7a   :  { %1232 = vmatpush3.bf16.msra.mxu0 %v1378_v22  ;;  %v1411_v22 = vld [vmem:[#allocation2 + $0xe0] sm:$0xff]  }
  0x7b   :  { %1233 = vmatprep.subr.bf16.mxu0 %v1561_v0 }
  0x7e   :  { %1234 = vmatpush3.bf16.msra.mxu0 %v1379_v23  ;;  %v1412_v23 = vld [vmem:[#allocation2 + $0xe8] sm:$0xff]  }
  0x7f   :  { %1235 = vmatprep.subr.bf16.mxu0 %v1561_v0 }
  0x82   :  { %1236 = vmatpush3.bf16.msra.mxu0 %v1380_v24  ;;  %v1413_v24 = vld [vmem:[#allocation2 + $0xf0] sm:$0xff]  }
  0x83   :  { %1237 = vmatprep.subr.bf16.mxu0 %v1561_v0 }
  0x86   :  { %1238 = vmatpush3.bf16.msra.mxu0 %v1381_v25  ;;  %v1077_v25 = vld [vmem:[#allocation6 + $0x2] ss:$0 sm:$0xff] }
  0x87   :  { %1239 = vmatprep.subr.bf16.mxu0 %v1561_v0 }
  0x8a   :  { %1240 = vmatpush3.bf16.msra.mxu0 %v1382_v34  ;;  %v1415_v34 = vld [vmem:[#allocation8 + $0xc0] sm:$0xff]  }
  0x8b   :  { %1265 = vmatprep.subr.bf16.mxu0 %v1561_v0 }
 0x140   :  { %v190_v27 = vpop.f32.mrb[0].mxu0 }
 0x141   :  { %v191_v28 = vadd.f32 %v1041_v26, %v190_v27  ;;  %v1203_v29 = vpop.f32.mrb[1].mxu0 }
 0x142   :  { %v193_v30 = vpop.f32.mrb[2].mxu0 }
 0x143   :  { %v196_v31 = vmax.f32 %v191_v28, 0.0  ;;  %v1204_v32 = vpop.f32.mrb[3].mxu0 }
 0x145   :  { %v197_v33 = vpack.c.bf16 %v196_v31, %v196_v31 }
 0x147   :  { %1222 = vmatmul.mubr.bf16.vlgmr.msra.gmra.mrb[0].mxu1 %v197_v33  ;;  %v1414_v33 = vld [vmem:[#allocation2 + $0xf8] sm:$0xff]  }
 0x148   :  { %1261 = vmatprep.mubr.msk.bf16.mxu1 %vm1562_vm0, %v1561_v0  ;;  %1246 = vmatpush3.bf16.msra.mxu1 %v1383_v35  ;;  %v1416_v35 = vld [vmem:[#allocation8 + $0xc8] sm:$0xff]  }
 0x149   :  { %1247 = vmatprep.subr.bf16.mxu1 %v1561_v0 }
 0x14c   :  { %1248 = vmatpush3.bf16.msra.mxu1 %v1384_v36  ;;  %v1417_v36 = vld [vmem:[#allocation8 + $0xd0] sm:$0xff]  }
 0x14d   :  { %1249 = vmatprep.subr.bf16.mxu1 %v1561_v0 }
 0x150   :  { %1250 = vmatpush3.bf16.msra.mxu1 %v1385_v37  ;;  %v1418_v37 = vld [vmem:[#allocation8 + $0xd8] sm:$0xff]  }
 0x151   :  { %1251 = vmatprep.subr.bf16.mxu1 %v1561_v0 }
 0x154   :  { %1252 = vmatpush3.bf16.msra.mxu1 %v1386_v38  ;;  %v1419_v38 = vld [vmem:[#allocation8 + $0xe0] sm:$0xff]  }
 0x155   :  { %1253 = vmatprep.subr.bf16.mxu1 %v1561_v0 }
 0x158   :  { %1254 = vmatpush3.bf16.msra.mxu1 %v1387_v39  ;;  %v1420_v39 = vld [vmem:[#allocation8 + $0xe8] sm:$0xff]  }
 0x159   :  { %1255 = vmatprep.subr.bf16.mxu1 %v1561_v0 }
 0x15c   :  { %1256 = vmatpush3.bf16.msra.mxu1 %v1388_v40  ;;  %v1086_v40 = vld [vmem:[#allocation9 + $0x2] ss:$0 sm:$0xff] }
 0x15d   :  { %1257 = vmatprep.subr.bf16.mxu1 %v1561_v0 }
 0x160   :  { %1258 = vmatpush3.bf16.msra.mxu1 %v1389_v48  ;;  %v1422_v48 = vld [vmem:[#allocation8 + $0xf8] sm:$0xff]  }
 0x161   :  { %1259 = vmatprep.subr.bf16.mxu1 %v1561_v0 }
 0x164   :  { %1260 = vmatpush3.bf16.msra.mxu1 %v1390_v49  ;;  %v1095_v49 = vld [vmem:[#allocation6 + $0x3] ss:$0 sm:$0xff] }
 0x165   :  { %1285 = vmatprep.subr.bf16.mxu1 %v1561_v0 }
 0x21a   :  { %v303_v42 = vpop.f32.mrb[0].mxu1 }
 0x21b   :  { %v304_v43 = vadd.f32 %v1050_v41, %v303_v42  ;;  %v1223_v44 = vpop.f32.mrb[1].mxu1 }
 0x21c   :  { %v306_v45 = vpop.f32.mrb[2].mxu1 }
 0x21d   :  { %v309_v46 = vpack.c.bf16 %v304_v43, %v304_v43  ;;  %v1224_v47 = vpop.f32.mrb[3].mxu1 }
 0x21e   :  { %v1421_v47 = vld [vmem:[#allocation8 + $0xf0] sm:$0xff]  }
 0x21f   :  { %1242 = vmatmul.mubr.bf16.vlgmr.msra.gmra.mrb[4].mxu0 %v309_v46 }
 0x220   :  { %1281 = vmatprep.mubr.msk.bf16.mxu0 %vm1562_vm0, %v1561_v0  ;;  %1266 = vmatpush3.bf16.msra.mxu0 %v1391_v50 }
 0x221   :  { %1267 = vmatprep.subr.bf16.mxu0 %v1561_v0 }
 0x224   :  { %1268 = vmatpush3.bf16.msra.mxu0 %v1392_v51 }
 0x225   :  { %1269 = vmatprep.subr.bf16.mxu0 %v1561_v0 }
 0x228   :  { %1270 = vmatpush3.bf16.msra.mxu0 %v1393_v52 }
 0x229   :  { %1271 = vmatprep.subr.bf16.mxu0 %v1561_v0 }
 0x22c   :  { %1272 = vmatpush3.bf16.msra.mxu0 %v1394_v53 }
 0x22d   :  { %1273 = vmatprep.subr.bf16.mxu0 %v1561_v0 }
 0x230   :  { %1274 = vmatpush3.bf16.msra.mxu0 %v1395_v54 }
 0x231   :  { %1275 = vmatprep.subr.bf16.mxu0 %v1561_v0 }
 0x234   :  { %1276 = vmatpush3.bf16.msra.mxu0 %v1396_v55 }
 0x235   :  { %1277 = vmatprep.subr.bf16.mxu0 %v1561_v0 }
 0x238   :  { %1278 = vmatpush3.bf16.msra.mxu0 %v1397_v56 }
 0x239   :  { %1279 = vmatprep.subr.bf16.mxu0 %v1561_v0 }
 0x23c   :  { %1280 = vmatpush3.bf16.msra.mxu0 %v1398_v2 }
 0x23d   :  { %1305 = vmatprep.subr.bf16.mxu0 %v1561_v0 }
 0x2f2   :  { %v417_v58 = vpop.f32.mrb[4].mxu0 }
 0x2f3   :  { %v418_v59 = vadd.f32 %v1059_v57, %v417_v58  ;;  %v1243_v60 = vpop.f32.mrb[5].mxu0  ;;  %v1104_v57 = vld [vmem:[#allocation9 + $0x3] ss:$0 sm:$0xff] }
 0x2f4   :  { %v420_v61 = vpop.f32.mrb[6].mxu0 }
 0x2f5   :  { %v423_v62 = vmax.f32 %v418_v59, 0.0  ;;  %v1244_v63 = vpop.f32.mrb[7].mxu0  ;;  %v997_v59 = vld [vmem:[%s1777_s1] sm:$0xff] }
 0x2f7   :  { %v424_v1 = vpack.c.bf16 %v423_v62, %v423_v62 }
 0x2f9   :  { %1262 = vmatmul.mubr.bf16.vlgmr.msra.gmra.mrb[4].mxu1 %v424_v1 }
 0x2fa   :  { %1301 = vmatprep.mubr.msk.bf16.mxu1 %vm1562_vm0, %v1561_v0  ;;  %1286 = vmatpush3.bf16.msra.mxu1 %v1399_v3 }
 0x2fb   :  { %1287 = vmatprep.subr.bf16.mxu1 %v1561_v0 }
 0x2fe   :  { %1288 = vmatpush3.bf16.msra.mxu1 %v1400_v4 }
 0x2ff   :  { %1289 = vmatprep.subr.bf16.mxu1 %v1561_v0 }
 0x302   :  { %1290 = vmatpush3.bf16.msra.mxu1 %v1401_v5 }
 0x303   :  { %1291 = vmatprep.subr.bf16.mxu1 %v1561_v0 }
 0x306   :  { %1292 = vmatpush3.bf16.msra.mxu1 %v1402_v6 }
 0x307   :  { %1293 = vmatprep.subr.bf16.mxu1 %v1561_v0 }
 0x30a   :  { %1294 = vmatpush3.bf16.msra.mxu1 %v1403_v7 }
 0x30b   :  { %1295 = vmatprep.subr.bf16.mxu1 %v1561_v0 }
 0x30e   :  { %1296 = vmatpush3.bf16.msra.mxu1 %v1404_v8 }
 0x30f   :  { %1297 = vmatprep.subr.bf16.mxu1 %v1561_v0 }
 0x312   :  { %1298 = vmatpush3.bf16.msra.mxu1 %v1405_v16 }
 0x313   :  { %1299 = vmatprep.subr.bf16.mxu1 %v1561_v0 }
 0x316   :  { %1300 = vmatpush3.bf16.msra.mxu1 %v1406_v17 }
 0x317   :  { %1325 = vmatprep.subr.bf16.mxu1 %v1561_v0 }
 0x3cc   :  { %v532_v10 = vpop.f32.mrb[4].mxu1 }
 0x3cd   :  { %v533_v11 = vadd.f32 %v1068_v9, %v532_v10  ;;  %v1263_v12 = vpop.f32.mrb[5].mxu1 }
 0x3ce   :  { %v535_v13 = vpop.f32.mrb[6].mxu1 }
 0x3cf   :  { %v538_v14 = vpack.c.bf16 %v533_v11, %v533_v11  ;;  %v1264_v15 = vpop.f32.mrb[7].mxu1 }
 0x3d1   :  { %1282 = vmatmul.mubr.bf16.vlgmr.msra.gmra.mrb[8].mxu0 %v538_v14 }
 0x3d2   :  { %1321 = vmatprep.mubr.msk.bf16.mxu0 %vm1562_vm0, %v1561_v0  ;;  %1306 = vmatpush3.bf16.msra.mxu0 %v1407_v18 }
 0x3d3   :  { %1307 = vmatprep.subr.bf16.mxu0 %v1561_v0 }
 0x3d6   :  { %1308 = vmatpush3.bf16.msra.mxu0 %v1408_v19 }
 0x3d7   :  { %1309 = vmatprep.subr.bf16.mxu0 %v1561_v0 }
 0x3da   :  { %1310 = vmatpush3.bf16.msra.mxu0 %v1409_v20 }
 0x3db   :  { %1311 = vmatprep.subr.bf16.mxu0 %v1561_v0 }
 0x3de   :  { %1312 = vmatpush3.bf16.msra.mxu0 %v1410_v21 }
 0x3df   :  { %1313 = vmatprep.subr.bf16.mxu0 %v1561_v0 }
 0x3e2   :  { %1314 = vmatpush3.bf16.msra.mxu0 %v1411_v22 }
 0x3e3   :  { %1315 = vmatprep.subr.bf16.mxu0 %v1561_v0 }
 0x3e6   :  { %1316 = vmatpush3.bf16.msra.mxu0 %v1412_v23 }
 0x3e7   :  { %1317 = vmatprep.subr.bf16.mxu0 %v1561_v0 }
 0x3ea   :  { %1318 = vmatpush3.bf16.msra.mxu0 %v1413_v24 }
 0x3eb   :  { %1319 = vmatprep.subr.bf16.mxu0 %v1561_v0 }
 0x3ee   :  { %1320 = vmatpush3.bf16.msra.mxu0 %v1414_v33 }
 0x4a4   :  { %v646_v26 = vpop.f32.mrb[8].mxu0 }
 0x4a5   :  { %v647_v27 = vadd.f32 %v1077_v25, %v646_v26  ;;  %v1283_v28 = vpop.f32.mrb[9].mxu0 }
 0x4a6   :  { %v649_v29 = vpop.f32.mrb[10].mxu0 }
 0x4a7   :  { %v652_v30 = vmax.f32 %v647_v27, 0.0  ;;  %v1284_v31 = vpop.f32.mrb[11].mxu0 }
 0x4a9   :  { %v653_v32 = vpack.c.bf16 %v652_v30, %v652_v30 }
 0x4ab   :  { %1302 = vmatmul.mubr.bf16.vlgmr.msra.gmra.mrb[8].mxu1 %v653_v32 }
 0x4ac   :  { %1341 = vmatprep.mubr.msk.bf16.mxu1 %vm1562_vm0, %v1561_v0  ;;  %1326 = vmatpush3.bf16.msra.mxu1 %v1415_v34 }
 0x4ad   :  { %1327 = vmatprep.subr.bf16.mxu1 %v1561_v0 }
 0x4b0   :  { %1328 = vmatpush3.bf16.msra.mxu1 %v1416_v35 }
 0x4b1   :  { %1329 = vmatprep.subr.bf16.mxu1 %v1561_v0 }
 0x4b4   :  { %1330 = vmatpush3.bf16.msra.mxu1 %v1417_v36 }
 0x4b5   :  { %1331 = vmatprep.subr.bf16.mxu1 %v1561_v0 }
 0x4b8   :  { %1332 = vmatpush3.bf16.msra.mxu1 %v1418_v37 }
 0x4b9   :  { %1333 = vmatprep.subr.bf16.mxu1 %v1561_v0 }
 0x4bc   :  { %1334 = vmatpush3.bf16.msra.mxu1 %v1419_v38 }
 0x4bd   :  { %1335 = vmatprep.subr.bf16.mxu1 %v1561_v0 }
 0x4c0   :  { %1336 = vmatpush3.bf16.msra.mxu1 %v1420_v39 }
 0x4c1   :  { %1337 = vmatprep.subr.bf16.mxu1 %v1561_v0 }
 0x4c4   :  { %1338 = vmatpush3.bf16.msra.mxu1 %v1421_v47 }
 0x4c5   :  { %1339 = vmatprep.subr.bf16.mxu1 %v1561_v0 }
 0x4c8   :  { %1340 = vmatpush3.bf16.msra.mxu1 %v1422_v48 }
 0x57e   :  { %v761_v41 = vpop.f32.mrb[8].mxu1 }
 0x57f   :  { %v762_v42 = vadd.f32 %v1086_v40, %v761_v41  ;;  %v1303_v43 = vpop.f32.mrb[9].mxu1 }
 0x580   :  { %v764_v44 = vpop.f32.mrb[10].mxu1 }
 0x581   :  { %v767_v45 = vpack.c.bf16 %v762_v42, %v762_v42  ;;  %v1304_v46 = vpop.f32.mrb[11].mxu1 }
 0x583   :  { %1322 = vmatmul.mubr.bf16.vlgmr.msra.gmra.mrb[12].mxu0 %v767_v45 }
 0x656   :  { %v875_v50 = vpop.f32.mrb[12].mxu0 }
 0x657   :  { %v876_v51 = vadd.f32 %v1095_v49, %v875_v50  ;;  %v1323_v52 = vpop.f32.mrb[13].mxu0 }
 0x658   :  { %v878_v53 = vpop.f32.mrb[14].mxu0 }
 0x659   :  { %v881_v54 = vmax.f32 %v876_v51, 0.0  ;;  %v1324_v55 = vpop.f32.mrb[15].mxu0 }
 0x65b   :  { %v882_v56 = vpack.c.bf16 %v881_v54, %v881_v54 }
 0x65d   :  { %1342 = vmatmul.mubr.bf16.vlgmr.msra.gmra.mrb[12].mxu1 %v882_v56 }
 0x730   :  { %v990_v58 = vpop.f32.mrb[12].mxu1 }
 0x731   :  { %v991_v60 = vadd.f32 %v1104_v57, %v990_v58  ;;  %v1343_v61 = vpop.f32.mrb[13].mxu1 }
 0x732   :  { %v993_v0 = vpop.f32.mrb[14].mxu1 }
 0x733   :  { %996 = vst [vmem:[#allocation11] sm:$0xff] %v991_v60  ;;  %v1344_v62 = vpop.f32.mrb[15].mxu1  ;;  %v998_v63 = vsub.f32 %v991_v60, %v997_v59 }
 0x735   :  { %v999_v1 = vmul.f32 %v998_v63, %v998_v63 }
 0x737   :  { %1000 = vadd.xlane.f32.xlu0 %v999_v1 }
 0x738   :  { %1522 = shalt.err (!%p1519_p8)
}
 0x739   :  { %s1523_s9 = scalar_lea.hbm %s1782_s6, 128 }
 0x73a   :  { %p1524_p9 = scmp.ne.s32.totalorder %s1782_s6, %s1523_s9  ;;  %p1527_p10 = scmp.lt.u32.totalorder %s1523_s9, %s1782_s6 }
 0x73c   :  { %p1529_p11 = pnand %p1527_p10, %p1524_p9 }
 0x73e   :  { %1532 = shalt.err (!%p1529_p11)
}
 0x73f   :  { %1020 = dma.vmem_to_hbm [thread:$0]  %s1018_s29, 128, %s1782_s6, [#allocation4]  }
 0x740   :  { %s1533_s20 = scalar_lea.hbm %s1783_s7, 16 }
 0x741   :  { %p1534_p12 = scmp.ne.s32.totalorder %s1783_s7, %s1533_s20  ;;  %p1537_p13 = scmp.lt.u32.totalorder %s1533_s20, %s1783_s7 }
 0x743   :  { %p1539_p0 = pnand %p1537_p13, %p1534_p12 }
 0x7c4   :  { %v1001_v2 = vpop.xlane.xlu0 %1000 }
 0x7c5   :  { %v1002_v3 = vrot.slane %v1001_v2, 4 }
 0x7c7   :  { %v1003_v4 = vadd.f32 %v1002_v3, %v1001_v2 }
 0x7c9   :  { %v1004_v5 = vrot.slane %v1003_v4, 2 }
 0x7cb   :  { %v1005_v6 = vadd.f32 %v1004_v5, %v1003_v4 }
 0x7cd   :  { %v1006_v7 = vrot.slane %v1005_v6, 1 }
 0x7cf   :  { %v1007_v8 = vadd.f32 %v1006_v7, %v1005_v6 }
 0x7d1   :  { %1345 = vpush %v1007_v8 }
 0x802   :  { %s1346_s2 = spop %1345 }
 0x803   :  { %1010 = sst [smem:[#allocation12]] %s1346_s2 }
 0x804   :  { %1542 = shalt.err (!%p1539_p0)
}
 0x805   :  { %s1564_s24 = smov [#allocation12]  }
 0x806   :  { %1028 = dma.smem_to_hbm %s1564_s24, 16, %s1783_s7, [#allocation5]  }
 0x807   :  { %1549 = dma.done.wait [#allocation4], 128  }
 0x808   :  { %1550 = vsyncadd [#allocation4], 4294967168 }
 0x809   :  { %1551 = dma.done.wait [#allocation5], 16  }
 0x80a   :  { %1552 = vsyncadd [#allocation5], 4294967280 }
 0x80b   :  { %1035 = sfence }
 0x80c   :  { %1036 = vsyncpa [#allocation3], 1 }
 0x80d   :  { %1037 = vsyncpa [#allocation7], 1 }
 0x80e   :  { %1038 = vsyncpa [#allocation10], 1 }
 0x80f   :  { %1039 = vsyncpa [#allocation4], 1 }
 0x810   :  { %1040 = vsyncpa [#allocation5], 1 }

</bundles_post_ra>
